<compile_context>
chip_gen: v7x
topology: tpu7x:2x2x1
jax: 0.10.0
libtpu: 0.0.40
codegen_flags: <defaults>
</compile_context>

<pallas_src>
import functools

import jax
import jax.numpy as jnp
from jax.experimental import pallas as pl
from jax.experimental.pallas import tpu as pltpu

GROUPS = 32
BASE_WIDTH = 4
BN_EPS = 1e-5

# Comfortably above the biggest double-buffered working set (~20 MiB for the
# decoder4 fused-deconv matmul) and below v7x's 64 MiB physical VMEM.
VMEM_LIMIT_BYTES = 48 * 1024 * 1024
# Single-K-step matmuls whenever K <= this; covers every layer in this net
# (max K = 9*512 = 4608 for the decoder4 fused deconv).
SINGLE_K_MAX = 4608


def _round_up(x, m):
    return ((x + m - 1) // m) * m


def _pick_tm(m):
    """Pick an M tile: big tiles amortize per-step overhead, avoid pad waste."""
    if m < 512:
        return _round_up(m, 16)          # single M tile, minimal padding
    _, neg_c = min(((-m) % c, -c) for c in (512, 256, 128))
    return -neg_c


# ------------------------------------------------------------------
# Pallas kernels
# ------------------------------------------------------------------

def _apply_act(out, act):
    if act == "relu":
        return jnp.maximum(out, 0.0)
    if act == "sigmoid":
        z = jnp.exp(-jnp.abs(out))       # numerically stable logistic
        return jnp.where(out >= 0.0, 1.0 / (1.0 + z), z / (1.0 + z))
    return out


# ---- single-K fast path (no accumulator scratch, no K grid axis) ----

def _mm_kernel_1k(a_ref, b_ref, bias_ref, o_ref, *, act):
    out = jnp.dot(a_ref[...], b_ref[...], preferred_element_type=jnp.float32)
    out = out + bias_ref[...]
    o_ref[...] = _apply_act(out, act).astype(o_ref.dtype)


def _mm_res_kernel_1k(a_ref, b_ref, bias_ref, res_ref, o_ref, *, act, res_mode):
    out = jnp.dot(a_ref[...], b_ref[...], preferred_element_type=jnp.float32)
    out = out + bias_ref[...]
    res = res_ref[...].astype(jnp.float32)
    if res_mode == "pre":                # bottleneck: relu(conv + identity)
        out = _apply_act(out + res, act)
    else:                                # UNet skip: relu(conv) + skip
        out = _apply_act(out, act) + res
    o_ref[...] = out.astype(o_ref.dtype)


# ---- K-tiled accumulator fallback (K > SINGLE_K_MAX; unused in this net) ----

def _mm_kernel_acc(a_ref, b_ref, bias_ref, o_ref, acc_ref, *, act):
    @pl.when(pl.program_id(2) == 0)
    def _():
        acc_ref[...] = jnp.zeros_like(acc_ref)

    acc_ref[...] += jnp.dot(a_ref[...], b_ref[...],
                            preferred_element_type=jnp.float32)

    @pl.when(pl.program_id(2) == pl.num_programs(2) - 1)
    def _():
        out = _apply_act(acc_ref[...] + bias_ref[...], act)
        o_ref[...] = out.astype(o_ref.dtype)


def _mm_res_kernel_acc(a_ref, b_ref, bias_ref, res_ref, o_ref, acc_ref, *,
                       act, res_mode):
    @pl.when(pl.program_id(2) == 0)
    def _():
        acc_ref[...] = jnp.zeros_like(acc_ref)

    acc_ref[...] += jnp.dot(a_ref[...], b_ref[...],
                            preferred_element_type=jnp.float32)

    @pl.when(pl.program_id(2) == pl.num_programs(2) - 1)
    def _():
        out = acc_ref[...] + bias_ref[...]
        res = res_ref[...].astype(jnp.float32)
        if res_mode == "pre":
            out = _apply_act(out + res, act)
        else:
            out = _apply_act(out, act) + res
        o_ref[...] = out.astype(o_ref.dtype)


def _grouped_packed_kernel(a_ref, b_ref, bias_ref, o_ref, *, act):
    out = jnp.dot(a_ref[0], b_ref[0],
                  preferred_element_type=jnp.float32) + bias_ref[0]
    o_ref[...] = _apply_act(out, act).astype(o_ref.dtype)


# ------------------------------------------------------------------
# Pallas wrappers
# ------------------------------------------------------------------

def matmul_bias_act(a, b, bias, *, act="none", residual=None, res_mode="pre",
                    out_dtype=jnp.bfloat16):
    """act(a @ b + bias [+ residual]).  a:(M,K) b:(K,N) bias:(N,)."""
    M, K = a.shape
    _, N = b.shape
    a = a.astype(jnp.bfloat16)
    b = b.astype(jnp.bfloat16)
    bias = bias.astype(jnp.float32)

    # ---- tile selection ----
    Np = _round_up(N, 128)
    tm = _pick_tm(M)
    Mp = _round_up(M, tm)
    if Np % 512 == 0:
        tn = 512
    elif Np % 256 == 0:
        tn = 256
    else:
        tn = 128
    # v7x has 2 TensorCores per chip: keep >= 2 tiles on a parallel grid axis.
    if Mp // tm == 1 and Np // tn == 1:
        if Np >= 256:
            tn = Np // 2 if (Np // 2) % 128 == 0 else 128
        elif Mp >= 32 and (Mp // 2) % 16 == 0:
            tm = Mp // 2

    single_k = K <= SINGLE_K_MAX          # true for every layer in this net
    if single_k:
        Kp = _round_up(K, 16)
        tk = Kp
    else:
        tk = 512
        Kp = _round_up(K, tk)

    # Small pads only (stem K=147->160, N=64/1->128); big weights need none.
    # TODO(synk): carry the M-padded activation into the next layer's im2col
    # instead of the de-pad slice below when only M is padded.
    if (Mp, Kp) != (M, K):
        a = jnp.pad(a, ((0, Mp - M), (0, Kp - K)))
    if (Kp, Np) != (K, N):
        b = jnp.pad(b, ((0, Kp - K), (0, Np - N)))
    biasp = bias if Np == N else jnp.pad(bias, (0, Np - N))
    biasp = biasp.reshape(1, Np)

    res = None
    if residual is not None:
        res = residual.astype(jnp.bfloat16)
        if (Mp, Np) != (M, N):
            res = jnp.pad(res, ((0, Mp - M), (0, Np - N)))

    if single_k:
        grid = (Mp // tm, Np // tn)
        in_specs = [
            pl.BlockSpec((tm, Kp), lambda i, j: (i, 0)),
            pl.BlockSpec((Kp, tn), lambda i, j: (0, j)),
            pl.BlockSpec((1, tn), lambda i, j: (0, j)),
        ]
        out_spec = pl.BlockSpec((tm, tn), lambda i, j: (i, j))
        args = [a, b, biasp]
        if res is not None:
            in_specs.append(pl.BlockSpec((tm, tn), lambda i, j: (i, j)))
            args.append(res)
            kernel = functools.partial(_mm_res_kernel_1k, act=act,
                                       res_mode=res_mode)
        else:
            kernel = functools.partial(_mm_kernel_1k, act=act)
        scratch = []
        semantics = ("parallel", "parallel")
    else:
        grid = (Mp // tm, Np // tn, Kp // tk)
        in_specs = [
            pl.BlockSpec((tm, tk), lambda i, j, k: (i, k)),
            pl.BlockSpec((tk, tn), lambda i, j, k: (k, j)),
            pl.BlockSpec((1, tn), lambda i, j, k: (0, j)),
        ]
        out_spec = pl.BlockSpec((tm, tn), lambda i, j, k: (i, j))
        args = [a, b, biasp]
        if res is not None:
            in_specs.append(pl.BlockSpec((tm, tn), lambda i, j, k: (i, j)))
            args.append(res)
            kernel = functools.partial(_mm_res_kernel_acc, act=act,
                                       res_mode=res_mode)
        else:
            kernel = functools.partial(_mm_kernel_acc, act=act)
        scratch = [pltpu.VMEM((tm, tn), jnp.float32)]
        semantics = ("parallel", "parallel", "arbitrary")

    out = pl.pallas_call(
        kernel,
        out_shape=jax.ShapeDtypeStruct((Mp, Np), out_dtype),
        grid_spec=pltpu.PrefetchScalarGridSpec(
            num_scalar_prefetch=0,
            grid=grid,
            in_specs=in_specs,
            out_specs=out_spec,
            scratch_shapes=scratch,
        ),
        compiler_params=pltpu.CompilerParams(
            dimension_semantics=semantics,
            vmem_limit_bytes=VMEM_LIMIT_BYTES),
    )(*args)
    if (Mp, Np) != (M, N):
        out = out[:M, :N]
    return out


def grouped_packed_matmul(a, b, bias, *, act="none", out_dtype=jnp.bfloat16):
    """Packed grouped matmul.

    a:(n_packs, M, K), b:(n_packs, K, N) block-diagonal packed weights,
    bias:(n_packs, 1, N).  Returns the lane-dense (M, n_packs*N) output;
    pack p writes column stripe [p*N, (p+1)*N).
    """
    n_packs, M, K = a.shape
    _, _, N = b.shape
    a = a.astype(jnp.bfloat16)
    b = b.astype(jnp.bfloat16)
    bias = bias.astype(jnp.float32)

    tm = _pick_tm(M)
    Mp = _round_up(M, tm)
    # v7x: make sure both TensorCores get a tile when the grid would be (1,1).
    if n_packs * (Mp // tm) == 1 and Mp >= 32 and (Mp // 2) % 16 == 0:
        tm = Mp // 2
    if Mp != M:
        a = jnp.pad(a, ((0, 0), (0, Mp - M), (0, 0)))

    out = pl.pallas_call(
        functools.partial(_grouped_packed_kernel, act=act),
        out_shape=jax.ShapeDtypeStruct((Mp, n_packs * N), out_dtype),
        grid_spec=pltpu.PrefetchScalarGridSpec(
            num_scalar_prefetch=0,
            grid=(n_packs, Mp // tm),      # pack outer -> weights stay resident
            in_specs=[
                pl.BlockSpec((1, tm, K), lambda g, i: (g, i, 0)),
                pl.BlockSpec((1, K, N), lambda g, i: (g, 0, 0)),
                pl.BlockSpec((1, 1, N), lambda g, i: (g, 0, 0)),
            ],
            out_specs=pl.BlockSpec((tm, N), lambda g, i: (i, g)),
        ),
        compiler_params=pltpu.CompilerParams(
            dimension_semantics=("parallel", "parallel"),
            vmem_limit_bytes=VMEM_LIMIT_BYTES),
    )(a, b, bias)
    if Mp != M:
        out = out[:M]
    return out


# ------------------------------------------------------------------
# Conv lowering glue (pure data movement, compute stays in Pallas)
# ------------------------------------------------------------------

def _extract_patches(x, k, stride, padding):
    """im2col: NHWC (bf16) -> (N, OH, OW, k*k*C), tap-major / channel-minor."""
    # TODO(synk): gather the k*k taps in-kernel (halo-blocked input tiles +
    # in-VMEM slices / pltpu.roll) to avoid materializing k*k-expanded patches
    # in HBM for the 3x3 / 7x7 convs.
    n, h, w, c = x.shape
    if padding:
        x = jnp.pad(x, ((0, 0), (padding, padding), (padding, padding), (0, 0)))
    hp, wp = h + 2 * padding, w + 2 * padding
    oh = (hp - k) // stride + 1
    ow = (wp - k) // stride + 1
    if k == 1:
        return x[:, ::stride, ::stride, :], oh, ow
    cols = []
    for kh in range(k):
        for kw in range(k):
            cols.append(x[:, kh:kh + stride * oh:stride,
                          kw:kw + stride * ow:stride, :])
    patches = jnp.stack(cols, axis=3)                 # (n, oh, ow, k*k, c)
    return patches.reshape(n, oh, ow, k * k * c), oh, ow


def conv2d(x, wmat, b, *, k, stride=1, padding=0, act="none", residual=None,
           res_mode="pre", out_dtype=jnp.bfloat16):
    """x: NHWC bf16, wmat: (k*k*cin, cout) pre-packed bf16, b: (cout,) f32."""
    n, _, _, cin = x.shape
    cout = wmat.shape[1]
    patches, oh, ow = _extract_patches(x, k, stride, padding)
    a = patches.reshape(n * oh * ow, k * k * cin)
    res = None if residual is None else residual.reshape(n * oh * ow, cout)
    out = matmul_bias_act(a, wmat, b, act=act, residual=res, res_mode=res_mode,
                          out_dtype=out_dtype)
    return out.reshape(n, oh, ow, cout)


def grouped_conv2d(x, wpacked, biasg, *, k, stride, padding, act="none"):
    """x: NHWC bf16, wpacked: (n_packs, k*k*pack_cin, pack_cout) block-diagonal
    pre-packed bf16, biasg: (n_packs, 1, pack_cout) f32."""
    n = x.shape[0]
    n_packs, kkpc, pack_cout = wpacked.shape
    kk = k * k
    pack_cin = kkpc // kk
    cout = n_packs * pack_cout
    patches, oh, ow = _extract_patches(x, k, stride, padding)
    m = n * oh * ow
    # Per-pack A: only each pack's own input channels, tap-major.
    a = patches.reshape(m, kk, n_packs, pack_cin)
    a = jnp.transpose(a, (2, 0, 1, 3)).reshape(n_packs, m, kk * pack_cin)
    out = grouped_packed_matmul(a, wpacked, biasg, act=act)   # (m, cout)
    return out.reshape(n, oh, ow, cout)


def conv_transpose2d(x, wmat, bias4):
    """ConvTranspose2d(kernel=4, stride=2, padding=1), fused to a single 3x3
    conv with 4*cout output channels (one per sub-pixel phase) followed by a
    pixel shuffle.  wmat: (9*cin, 4*cout) pre-packed bf16, bias4: (4*cout,)."""
    n, h, wdt, _ = x.shape
    cout = wmat.shape[1] // 4
    y = conv2d(x, wmat, bias4, k=3, stride=1, padding=1, act="none")
    y = y.reshape(n, h, wdt, 2, 2, cout)               # (n, r, c, py, px, co)
    y = jnp.transpose(y, (0, 1, 3, 2, 4, 5))
    return y.reshape(n, 2 * h, 2 * wdt, cout)


# ------------------------------------------------------------------
# Parameter construction: deterministic synthetic weights, pre-packed into
# matmul layout / block-diagonal packs / fused-deconv form (done ONCE, eager).
# ------------------------------------------------------------------

class KeyGen:
    def __init__(self, seed):
        self._key = jax.random.PRNGKey(seed)

    def __call__(self):
        self._key, sub = jax.random.split(self._key)
        return sub


def _conv_w_to_mat(w):
    """(cout, cin, k, k) -> (k*k*cin, cout) bf16, tap-major / channel-minor."""
    cout, cin, k, _ = w.shape
    return jnp.transpose(w, (2, 3, 1, 0)).reshape(k * k * cin, cout).astype(
        jnp.bfloat16)


def make_conv(kg, cin, cout, k):
    fan_in = cin * k * k
    w = jax.random.normal(kg(), (cout, cin, k, k), jnp.float32) * (2.0 / fan_in) ** 0.5
    b = 0.01 * jax.random.normal(kg(), (cout,), jnp.float32)
    return _conv_w_to_mat(w), b


def make_conv_bn(kg, cin, cout, k):
    """Conv (bias=False) + BatchNorm folded in eval mode (running stats 0/1)."""
    fan_in = cin * k * k
    w = jax.random.normal(kg(), (cout, cin, k, k), jnp.float32) * (2.0 / fan_in) ** 0.5
    gamma = 1.0 + 0.1 * jax.random.normal(kg(), (cout,), jnp.float32)
    beta = 0.05 * jax.random.normal(kg(), (cout,), jnp.float32)
    scale = gamma / jnp.sqrt(1.0 + BN_EPS)
    return _conv_w_to_mat(w * scale[:, None, None, None]), beta


def make_grouped_conv_bn(kg, cin, cout, k, groups):
    """Grouped conv + folded BN, pre-packed block-diagonally so that
    128 // cout_g groups share one lane-dense 128-wide output stripe."""
    cin_g = cin // groups
    cout_g = cout // groups
    fan_in = cin_g * k * k
    w = jax.random.normal(kg(), (cout, cin_g, k, k), jnp.float32) * (2.0 / fan_in) ** 0.5
    gamma = 1.0 + 0.1 * jax.random.normal(kg(), (cout,), jnp.float32)
    beta = 0.05 * jax.random.normal(kg(), (cout,), jnp.float32)
    scale = gamma / jnp.sqrt(1.0 + BN_EPS)
    w = w * scale[:, None, None, None]

    # NOTE(v5e): packing gpp groups per stripe inflates MXU MACs by gpp
    # (only 1/gpp of the packed K is nonzero).  Acceptable on v6e/v7x MXU
    # headroom; on v5e profile layer1/2 and consider per-group matmuls.
    if cout % 128 == 0 and 128 % cout_g == 0:
        gpp = 128 // cout_g
    else:
        gpp = groups                       # fallback: single (masked) stripe
    n_packs = groups // gpp
    kk = k * k
    wg = w.reshape(groups, cout_g, cin_g, k, k)
    wmat = jnp.transpose(wg, (0, 3, 4, 2, 1))          # (G, kh, kw, ci, co)
    wmat = wmat.reshape(n_packs, gpp, kk, cin_g, cout_g)
    eye = jnp.eye(gpp, dtype=w.dtype)
    wpacked = jnp.einsum("qr,pqtic->ptqirc", eye, wmat)
    wpacked = wpacked.reshape(n_packs, kk * gpp * cin_g,
                              gpp * cout_g).astype(jnp.bfloat16)
    biasg = beta.reshape(n_packs, 1, gpp * cout_g).astype(jnp.float32)
    return wpacked, biasg


def _pack_deconv_fused(w, b):
    """Fuse ConvTranspose2d(k=4,s=2,p=1) weight (cin,cout,4,4) into a single
    3x3-conv matmul weight (9*cin, 4*cout): each sub-pixel phase's 2x2 deconv
    taps are zero-embedded into a 3x3 kernel (padding=1), output channel
    index = phase*cout + co for the subsequent pixel shuffle."""
    cin, cout = w.shape[0], w.shape[1]
    pos = ((0, 1), (1, 2))     # 3x3-conv tap positions for even / odd phase
    tap = ((3, 1), (2, 0))     # corresponding deconv kernel taps
    w3 = jnp.zeros((4, cout, cin, 3, 3), jnp.float32)
    for py in range(2):
        for px in range(2):
            ph = 2 * py + px
            for a in range(2):
                for c in range(2):
                    w3 = w3.at[ph, :, :, pos[py][a], pos[px][c]].set(
                        jnp.transpose(w[:, :, tap[py][a], tap[px][c]]))
    w3 = w3.reshape(4 * cout, cin, 3, 3)
    wmat = jnp.transpose(w3, (2, 3, 1, 0)).reshape(9 * cin, 4 * cout).astype(
        jnp.bfloat16)
    bias4 = jnp.tile(b, 4).astype(jnp.float32)
    return wmat, bias4


def make_deconv(kg, cin, cout):
    fan_in = cin * 16
    w = jax.random.normal(kg(), (cin, cout, 4, 4), jnp.float32) * (2.0 / fan_in) ** 0.5
    b = 0.01 * jax.random.normal(kg(), (cout,), jnp.float32)
    return _pack_deconv_fused(w, b)


def make_bottleneck(kg, inplanes, planes, downsample):
    width = int(planes * (BASE_WIDTH / 64.0)) * GROUPS
    p = {
        "conv1": make_conv_bn(kg, inplanes, width, 1),
        "conv2": make_grouped_conv_bn(kg, width, width, 3, GROUPS),
        "conv3": make_conv_bn(kg, width, planes * 4, 1),
    }
    if downsample:
        p["down"] = make_conv_bn(kg, inplanes, planes * 4, 1)
    return p


def make_decoder(kg, cin, cout):
    return {
        "conv1": make_conv(kg, cin, cin // 4, 1),
        "deconv": make_deconv(kg, cin // 4, cin // 4),
        "conv2": make_conv(kg, cin // 4, cout, 1),
    }


LAYER_CFG = (("layer1", 64, 3, 1), ("layer2", 128, 4, 2),
             ("layer3", 256, 6, 2), ("layer4", 512, 3, 2))


def build_params(kg, n_classes=1):
    p = {"conv1": make_conv_bn(kg, 3, 64, 7)}     # encoder0 (maxpool skipped)
    inplanes = 64
    for name, planes, blocks, _stride in LAYER_CFG:
        layer = [make_bottleneck(kg, inplanes, planes, downsample=True)]
        inplanes = planes * 4
        for _ in range(blocks - 1):
            layer.append(make_bottleneck(kg, inplanes, planes, downsample=False))
        p[name] = layer
    filters = [256, 512, 1024, 2048]
    p["decoder4"] = make_decoder(kg, filters[3], filters[2])
    p["decoder3"] = make_decoder(kg, filters[2], filters[1])
    p["decoder2"] = make_decoder(kg, filters[1], filters[0])
    p["decoder1"] = make_decoder(kg, filters[0], filters[0])
    p["last_conv0"] = make_conv(kg, 256, 128, 3)
    p["last_conv1"] = make_conv(kg, 128, n_classes, 3)
    return p


# ------------------------------------------------------------------
# Forward pass
# ------------------------------------------------------------------

def bottleneck_fwd(x, p, stride):
    if "down" in p:
        w, b = p["down"]
        identity = conv2d(x, w, b, k=1, stride=stride, padding=0, act="none")
    else:
        identity = x
    w, b = p["conv1"]
    out = conv2d(x, w, b, k=1, act="relu")
    wp, bg = p["conv2"]
    out = grouped_conv2d(out, wp, bg, k=3, stride=stride, padding=1, act="relu")
    w, b = p["conv3"]
    # residual add + relu fused into the conv3 matmul epilogue
    return conv2d(out, w, b, k=1, act="relu", residual=identity, res_mode="pre")


def decoder_fwd(x, p, skip=None):
    w, b = p["conv1"]
    x = conv2d(x, w, b, k=1, act="relu")
    w, b = p["deconv"]
    x = conv_transpose2d(x, w, b)
    w, b = p["conv2"]
    # UNet skip add fused into the conv2 epilogue (after the ReLU)
    return conv2d(x, w, b, k=1, act="relu", residual=skip, res_mode="post")


@jax.jit
def resnext_unet_forward(x_nchw, p):
    x = jnp.transpose(x_nchw, (0, 2, 3, 1)).astype(jnp.bfloat16)  # NCHW->NHWC
    w, b = p["conv1"]
    x = conv2d(x, w, b, k=7, stride=2, padding=3, act="relu")      # encoder0
    enc = []
    for name, _planes, _blocks, stride in LAYER_CFG:
        blocks = p[name]
        x = bottleneck_fwd(x, blocks[0], stride)
        for blk in blocks[1:]:
            x = bottleneck_fwd(x, blk, 1)
        enc.append(x)
    e1, e2, e3, e4 = enc
    d4 = decoder_fwd(e4, p["decoder4"], skip=e3)
    d3 = decoder_fwd(d4, p["decoder3"], skip=e2)
    d2 = decoder_fwd(d3, p["decoder2"], skip=e1)
    d1 = decoder_fwd(d2, p["decoder1"])
    w, b = p["last_conv0"]
    out = conv2d(d1, w, b, k=3, stride=1, padding=1, act="relu")
    w, b = p["last_conv1"]
    out = conv2d(out, w, b, k=3, stride=1, padding=1, act="sigmoid",
                 out_dtype=jnp.float32)
    return jnp.transpose(out, (0, 3, 1, 2))                        # back to NCHW


# ------------------------------------------------------------------
# Reference for the fused-deconv numerical self-check
# ------------------------------------------------------------------

def _deconv_reference(x_nhwc, w, b):
    """Exact ConvTranspose2d(k=4, s=2, p=1) via lhs-dilated convolution."""
    wf = jnp.transpose(w[:, :, ::-1, ::-1], (2, 3, 0, 1))   # HWIO, I=cin,O=cout
    y = jax.lax.conv_general_dilated(
        x_nhwc, wf, window_strides=(1, 1), padding=((2, 2), (2, 2)),
        lhs_dilation=(2, 2), dimension_numbers=("NHWC", "HWIO", "NHWC"))
    return y + b


# ------------------------------------------------------------------

if __name__ == "__main__":
    k1, k2, k3, k4 = jax.random.split(jax.random.PRNGKey(0), 4)

    # Numerical self-check of the fused ConvTranspose2d lowering.
    cin = cout = 32
    xt = jax.random.normal(k1, (1, 4, 4, cin), jnp.float32)
    wt = jax.random.normal(k2, (cin, cout, 4, 4), jnp.float32) * (2.0 / (cin * 16)) ** 0.5
    bt = 0.01 * jax.random.normal(k3, (cout,), jnp.float32)
    wmat_t, bias_t = _pack_deconv_fused(wt, bt)
    got = conv_transpose2d(xt.astype(jnp.bfloat16), wmat_t, bias_t)
    got = jax.block_until_ready(got).astype(jnp.float32)
    want = _deconv_reference(xt, wt, bt)
    assert got.shape == want.shape, (got.shape, want.shape)
    assert bool(jnp.allclose(got, want, atol=5e-2, rtol=5e-2)), \
        float(jnp.max(jnp.abs(got - want)))

    # Full ResNeXtUNet forward.
    kg = KeyGen(42)
    params = build_params(kg, n_classes=1)
    x = jax.random.normal(k4, (2, 3, 16, 16), jnp.float32)
    out = jax.block_until_ready(resnext_unet_forward(x, params))

    assert out.shape == (2, 1, 16, 16), out.shape
    assert bool(jnp.all(jnp.isfinite(out)))
    assert bool(jnp.all((out >= 0.0) & (out <= 1.0)))   # sigmoid output range
    print("KERNEL_OK")
</pallas_src>

<mosaic_0001>
module attributes {stable_mosaic.version = 11 : i64} {
  func.func @_mm_kernel_1k(%arg0: i32, %arg1: i32, %arg2: memref<16x288xbf16, #tpu.memory_space<vmem>>, %arg3: memref<288x128xbf16, #tpu.memory_space<vmem>>, %arg4: memref<1x128xf32, #tpu.memory_space<vmem>>, %arg5: memref<16x128xbf16, #tpu.memory_space<vmem>>) attributes {dimension_semantics = [#tpu.dimension_semantics<parallel>, #tpu.dimension_semantics<parallel>], iteration_bounds = array<i64: 1, 1>, scalar_prefetch = 0 : i64, scratch_operands = 0 : i64, tpu.core_type = #tpu.core_type<tc>, window_params = [{transform_indices = @transform_0, window_bounds = array<i64: 16, 288>}, {transform_indices = @transform_1, window_bounds = array<i64: 288, 128>}, {transform_indices = @transform_2, window_bounds = array<i64: 1, 128>}, {transform_indices = @transform_3, window_bounds = array<i64: 16, 128>}]} {
    %c0 = arith.constant 0 : index
    %c0_0 = arith.constant 0 : index
    %0 = vector.load %arg2[%c0, %c0_0] : memref<16x288xbf16, #tpu.memory_space<vmem>>, vector<16x288xbf16>
    %c0_1 = arith.constant 0 : index
    %c0_2 = arith.constant 0 : index
    %1 = vector.load %arg3[%c0_1, %c0_2] : memref<288x128xbf16, #tpu.memory_space<vmem>>, vector<288x128xbf16>
    %cst = arith.constant dense<0.000000e+00> : vector<16x128xf32>
    %2 = tpu.matmul %0, %1, %cst {dimension_numbers = #tpu.dot_dimension_numbers<[1], [0], [0], [1], [0, 0, 1, 1], [], []>} : vector<16x288xbf16>, vector<288x128xbf16>, vector<16x128xf32> -> vector<16x128xf32>
    %c0_3 = arith.constant 0 : index
    %c0_4 = arith.constant 0 : index
    %3 = vector.load %arg4[%c0_3, %c0_4] : memref<1x128xf32, #tpu.memory_space<vmem>>, vector<1x128xf32>
    %4 = vector.broadcast %3 : vector<1x128xf32> to vector<16x128xf32>
    %5 = arith.addf %2, %4 : vector<16x128xf32>
    %6 = arith.truncf %5 : vector<16x128xf32> to vector<16x128xbf16>
    %c0_5 = arith.constant 0 : index
    %c0_6 = arith.constant 0 : index
    %7 = vector.load %arg5[%c0_5, %c0_6] : memref<16x128xbf16, #tpu.memory_space<vmem>>, vector<16x128xbf16>
    tpu.vector_store %arg5[%c0_5, %c0_6], %6 {strides = array<i32>} : memref<16x128xbf16, #tpu.memory_space<vmem>>, vector<16x128xbf16>,
    return
  }
  func.func @transform_0(%arg0: i32, %arg1: i32) -> (i32, i32) {
    %c0_i32 = arith.constant 0 : i32
    %c0_i32_0 = arith.constant 0 : i32
    return %arg0, %c0_i32 : i32, i32
  }
  func.func @transform_1(%arg0: i32, %arg1: i32) -> (i32, i32) {
    %c0_i32 = arith.constant 0 : i32
    %c0_i32_0 = arith.constant 0 : i32
    return %c0_i32, %arg1 : i32, i32
  }
  func.func @transform_2(%arg0: i32, %arg1: i32) -> (i32, i32) {
    %c0_i32 = arith.constant 0 : i32
    %c0_i32_0 = arith.constant 0 : i32
    return %c0_i32, %arg1 : i32, i32
  }
  func.func @transform_3(%arg0: i32, %arg1: i32) -> (i32, i32) {
    %c0_i32 = arith.constant 0 : i32
    return %arg0, %arg1 : i32, i32
  }
}

</mosaic_0001>

<bundles_post_ra>
// kernel: tpu_custom_call.1
= control target key start
LH: loop header
LB: loop body
LE: loop exit
PB: predicated region body
PF: predicated region fallthrough
CT: control target
= control target key end

     0   :  { %8 = vsyncpa [#allocation3], 0  ;;  %s570_s0 = inlined_call_operand.hbm [shape: bf16[16,288], index: 0, kind: input, shape index: {}]   ;;  %s571_s1 = inlined_call_operand.hbm [shape: bf16[288,128], index: 1, kind: input, shape index: {}]   ;;  %s572_s2 = inlined_call_operand.vmem [shape: f32[1,128], index: 2, kind: input, shape index: {}]   ;;  %s573_s3 = inlined_call_operand.hbm [shape: bf16[16,128], index: 3, kind: output, shape index: {}]  }
   0x1   :  { %9 = vsyncpa [#allocation6], 0 }
   0x2   :  { %10 = vsyncpa [#allocation4], 0  ;;  %s496_s12 = smov [#allocation2]   ;;  %s424_s16 = scalar_lea.hbm %s570_s0, 384 }
   0x3   :  { %s16_s13 = sshll.u32 %s496_s12, 4  ;;  %p425_p0 = scmp.ne.s32.totalorder %s570_s0, %s424_s16  ;;  %s17_s13 = int_to_ptr.vmem [resolvable:$true] %s16_s13 }
   0x4   :  { %p428_p1 = scmp.lt.u32.totalorder %s424_s16, %s570_s0 }
   0x6   :  { %p430_p2 = pnand %p428_p1, %p425_p0 }
   0x8   :  { %433 = shalt.err (!%p430_p2)
}
   0x9   :  { %s434_s21 = scalar_lea.vmem %s17_s13, 384  ;;  %p439_p4 = scmp.lt.s32.totalorder %s17_s13, %s17_s13 }
   0xa   :  { %p435_p3 = scmp.ne.s32.totalorder %s17_s13, %s434_s21  ;;  %p440_p5 = scmp.lt.s32.totalorder %s434_s21, %s434_s21 }
   0xc   :  { %p441_p6 = por %p440_p5, %p439_p4 }
   0xe   :  { %p442_p7 = pnand %p441_p6, %p435_p3 }
  0x10   :  { %445 = shalt.err (!%p442_p7)
}
  0x11   :  { %s497_s22 = smov 192   ;;  %s498_s23 = smov 12  }
  0x12   :  { %22 = dma.hbm_to_vmem [thread:$0]  %s570_s0, 384, %s17_s13, [#allocation3], %s497_s22, %s497_s22, %s498_s23  }
  0x13   :  { %s499_s26 = smov [#allocation5]   ;;  %s446_s30 = scalar_lea.hbm %s571_s1, 2304 }
  0x14   :  { %s28_s27 = sshll.u32 %s499_s26, 4  ;;  %p447_p8 = scmp.ne.s32.totalorder %s571_s1, %s446_s30  ;;  %s29_s27 = int_to_ptr.vmem [resolvable:$true] %s28_s27 }
  0x15   :  { %p450_p9 = scmp.lt.u32.totalorder %s446_s30, %s571_s1 }
  0x17   :  { %p452_p10 = pnand %p450_p9, %p447_p8 }
  0x19   :  { %455 = shalt.err (!%p452_p10)
}
  0x1a   :  { %s456_s8 = scalar_lea.vmem %s29_s27, 2304  ;;  %p461_p12 = scmp.lt.s32.totalorder %s29_s27, %s29_s27 }
  0x1b   :  { %p457_p11 = scmp.ne.s32.totalorder %s29_s27, %s456_s8  ;;  %p462_p13 = scmp.lt.s32.totalorder %s456_s8, %s456_s8 }
  0x1d   :  { %p463_p0 = por %p462_p13, %p461_p12 }
  0x1f   :  { %p464_p1 = pnand %p463_p0, %p457_p11 }
  0x21   :  { %467 = shalt.err (!%p464_p1)
}
  0x22   :  { %s500_s0 = smov 64   ;;  %s501_s9 = smov 4  }
  0x23   :  { %34 = dma.hbm_to_vmem [thread:$0]  %s571_s1, 2304, %s29_s27, [#allocation6], %s500_s0, %s500_s0, %s501_s9  }
  0x24   :  { %490 = dma.done.wait [#allocation3], 384  }
  0x25   :  { %491 = vsyncadd [#allocation3], 4294966912 }
  0x26   :  { %492 = dma.done.wait [#allocation6], 2304  }
  0x27   :  { %493 = vsyncadd [#allocation6], 4294964992  ;;  %v502_v0 = vmov 0.0   ;;  %vm503_vm0 = vmmov 0   ;;  %v402_v1 = vld [vmem:[#allocation5 + $0x40] sm:$0xff]   ;;  %v404_v3 = vld [vmem:[#allocation5 + $0x48] sm:$0xff]  }
  0x28   :  { %385 = vmatprep.subr.bf16.mxu1 %v502_v0  ;;  %389 = vmatprep.mubr.msk.bf16.mxu1 %vm503_vm0, %v502_v0  ;;  %v403_v2 = vld [vmem:[#allocation5] sm:$0xff]   ;;  %v405_v4 = vld [vmem:[#allocation5 + $0x8] sm:$0xff]   ;;  %v406_v5 = vld [vmem:[#allocation5 + $0x50] sm:$0xff]   ;;  %vm214_vm1 = vcmask 261120   ;;  %s504_s13 = smov [#allocation7]  }
  0x29   :  { %360 = vmatprep.subr.bf16.mxu0 %v402_v1  ;;  %v407_v6 = vld [vmem:[#allocation5 + $0x10] sm:$0xff]   ;;  %v408_v7 = vld [vmem:[#allocation5 + $0x58] sm:$0xff]   ;;  %v410_v9 = vld [vmem:[#allocation5 + $0x60] sm:$0xff]   ;;  %s315_s14 = sshll.u32 %s504_s13, 4  ;;  %s316_s14 = int_to_ptr.vmem [resolvable:$true] %s315_s14 }
  0x2a   :  { %361 = vmatpush3.bf16.msra.mxu0 %v403_v2  ;;  %v409_v8 = vld [vmem:[#allocation5 + $0x18] sm:$0xff]   ;;  %v416_v10 = vld [vmem:[#allocation5 + $0x80] sm:$0xff]   ;;  %v412_v12 = vld [vmem:[#allocation5 + $0x68] sm:$0xff]   ;;  %s468_s15 = scalar_lea.vmem %s316_s14, 128  ;;  %p473_p3 = scmp.lt.s32.totalorder %s316_s14, %s316_s14 }
  0x2b   :  { %362 = vmatprep.subr.bf16.mxu0 %v404_v3  ;;  %v411_v11 = vld [vmem:[#allocation5 + $0x20] sm:$0xff]   ;;  %386 = vmatpush3.bf16.msra.mxu1 %v416_v10  ;;  %v413_v13 = vld [vmem:[#allocation5 + $0x28] sm:$0xff]   ;;  %v414_v16 = vld [vmem:[#allocation5 + $0x70] sm:$0xff]   ;;  %p469_p2 = scmp.ne.s32.totalorder %s316_s14, %s468_s15  ;;  %p474_p4 = scmp.lt.s32.totalorder %s468_s15, %s468_s15 }
  0x2c   :  { %387 = vmatprep.subr.bf16.mxu1 %v502_v0  ;;  %v421_v14 = vld [vmem:[#allocation2 + $0x4] ss:$12 sps:$4 sm:$0xff]   ;;  %v423_v17 = vld [vmem:[#allocation2 + $0x8] ss:$12 sps:$4 sm:$0xff]   ;;  %v419_v21 = vld [vmem:[#allocation2] ss:$12 sps:$4 sm:$0xff]  }
  0x2d   :  { %v422_v15 = vld [vmem:[#allocation5 + $0x88] sm:$0xff]   ;;  %250 = vmatprep.mubr.bf16.mxu0 %v421_v14  ;;  %v415_v18 = vld [vmem:[#allocation5 + $0x30] sm:$0xff]   ;;  %v417_v19 = vld [vmem:[#allocation5 + $0x78] sm:$0xff]   ;;  %p475_p5 = por %p474_p4, %p473_p3 }
  0x2e   :  { %363 = vmatpush3.bf16.msra.mxu0 %v405_v4  ;;  %v418_v20 = vld [vmem:[#allocation5 + $0x38] sm:$0xff]   ;;  %v328_v28 = vld [vmem:[%s572_s2] ss:$0 sm:$0xff] }
  0x2f   :  { %364 = vmatprep.subr.bf16.mxu0 %v406_v5  ;;  %388 = vmatpush3.bf16.msra.mxu1 %v422_v15  ;;  %p476_p6 = pnand %p475_p5, %p469_p2 }
  0x32   :  { %365 = vmatpush3.bf16.msra.mxu0 %v407_v6  ;;  %390 = vmatmul.mubr.msk.bf16.vlgmr.msra.gmra.mrb[0].mxu1 %vm214_vm1, %v423_v17 }
  0x33   :  { %366 = vmatprep.subr.bf16.mxu0 %v408_v7 }
  0x36   :  { %367 = vmatpush3.bf16.msra.mxu0 %v409_v8 }
  0x37   :  { %368 = vmatprep.subr.bf16.mxu0 %v410_v9 }
  0x3a   :  { %369 = vmatpush3.bf16.msra.mxu0 %v411_v11 }
  0x3b   :  { %370 = vmatprep.subr.bf16.mxu0 %v412_v12 }
  0x3e   :  { %371 = vmatpush3.bf16.msra.mxu0 %v413_v13 }
  0x3f   :  { %372 = vmatprep.subr.bf16.mxu0 %v414_v16 }
  0x42   :  { %373 = vmatpush3.bf16.msra.mxu0 %v415_v18 }
  0x43   :  { %374 = vmatprep.subr.bf16.mxu0 %v417_v19 }
  0x46   :  { %375 = vmatpush3.bf16.msra.mxu0 %v418_v20 }
  0x49   :  { %251 = vmatmul.mubr.bf16.vlgmr.msra.gmra.mrb[0].mxu0 %v419_v21 }
 0x105   :  { %v293_v22 = vpop.f32.mrb[0].mxu1 }
 0x106   :  { %v391_v23 = vpop.f32.mrb[1].mxu1 }
 0x107   :  { %v296_v24 = vpop.f32.mrb[2].mxu1 }
 0x108   :  { %v392_v25 = vpop.f32.mrb[3].mxu1 }
 0x11c   :  { %v376_v26 = vpop.f32.mrb[0].mxu0 }
 0x11d   :  { %v377_v27 = vpop.f32.mrb[1].mxu0 }
 0x11e   :  { %v378_v29 = vadd.f32 %v377_v27, %v376_v26  ;;  %v379_v30 = vpop.f32.mrb[2].mxu0 }
 0x11f   :  { %v380_v31 = vpop.f32.mrb[3].mxu0 }
 0x120   :  { %v253_v32 = vadd.f32 %v378_v29, %v328_v28  ;;  %v381_v33 = vadd.f32 %v380_v31, %v379_v30 }
 0x122   :  { %v294_v34 = vadd.f32 %v293_v22, %v253_v32  ;;  %v256_v35 = vadd.f32 %v381_v33, %v328_v28 }
 0x124   :  { %v297_v36 = vadd.f32 %v296_v24, %v256_v35 }
 0x126   :  { %v358_v37 = vpack.c.bf16 %v297_v36, %v294_v34 }
 0x128   :  { %359 = vst [vmem:[#allocation7] sm:$0xff] %v358_v37  }
 0x129   :  { %479 = shalt.err (!%p476_p6)
}
 0x12a   :  { %s480_s17 = scalar_lea.hbm %s573_s3, 128 }
 0x12b   :  { %p481_p7 = scmp.ne.s32.totalorder %s573_s3, %s480_s17  ;;  %p484_p8 = scmp.lt.u32.totalorder %s480_s17, %s573_s3 }
 0x12d   :  { %p486_p9 = pnand %p484_p8, %p481_p7 }
 0x12f   :  { %489 = shalt.err (!%p486_p9)
}
 0x130   :  { %321 = dma.vmem_to_hbm [thread:$0]  %s316_s14, 128, %s573_s3, [#allocation4], %s500_s0, %s500_s0, %s501_s9  }
 0x131   :  { %494 = dma.done.wait [#allocation4], 128  }
 0x132   :  { %495 = vsyncadd [#allocation4], 4294967168 }
 0x133   :  { %325 = vsyncpa [#allocation3], 1 }
 0x134   :  { %326 = vsyncpa [#allocation6], 1 }
 0x135   :  { %327 = vsyncpa [#allocation4], 1 }

</bundles_post_ra>
